<compile_context>
chip_gen: v5e
topology: v5e:2x2
jax: 0.10.0
libtpu: 0.0.40
codegen_flags: <defaults>
</compile_context>

<pallas_src>
import functools

import jax
import jax.numpy as jnp
from jax.experimental import pallas as pl
from jax.experimental.pallas import tpu as pltpu

EPSILON = 1e-6


def _sublane_granule(itemsize: int) -> int:
    # f32 -> 8, bf16 -> 16, int8/fp8 -> 32 (sub-32-bit packs along sublanes).
    return {4: 8, 2: 16, 1: 32}.get(itemsize, 8)


def _round_up(x: int, m: int) -> int:
    return ((x + m - 1) // m) * m


def _vmem_config():
    """(buffer_budget_bytes, vmem_limit_bytes), generation aware."""
    phys = None
    try:
        phys = getattr(pltpu.get_tpu_info(), "vmem_capacity_bytes", None)
    except Exception:
        phys = None
    if phys is not None and phys >= (128 << 20):
        # v5e / v6e: 128 MiB physical VMEM -> bigger tiles for wide rows.
        return 48 << 20, 64 << 20
    # v7x (64 MiB physical) or unknown: stay conservative.
    return 20 << 20, 32 << 20


def _pick_tile_rows(rows: int, d: int, itemsize: int, buffer_budget: int) -> int:
    """Largest sublane-aligned row tile whose VMEM footprint fits the budget,
    clamped so the grid keeps several steps (pipelining + 2-TC split)."""
    granule = _sublane_granule(itemsize)

    # Per-row VMEM bytes per grid step:
    #   2 (double buffer) x 2 (in + out) pipelined tiles in the input dtype
    #   + ~3 f32 compute temporaries (x_f32, centered, squared) over the tile.
    bytes_per_row = 2 * 2 * d * itemsize + 3 * d * 4
    t_budget = max(granule, buffer_budget // max(bytes_per_row, 1))
    t_budget = max(granule, (t_budget // granule) * granule)

    # Keep the grid from collapsing to 1-2 steps: >= ~8 steps when the problem
    # has that many granule-sized tiles.  Restores DMA/compute overlap and the
    # dimension_semantics=("parallel",) split across v7x's two TensorCores.
    max_tiles = max(1, rows // granule)
    desired_steps = min(8, max_tiles)
    t_steps = _round_up(pl.cdiv(rows, desired_steps), granule)

    t = min(t_budget, t_steps, _round_up(rows, granule))
    return max(granule, t)


def _layernorm_kernel(params_ref, x_ref, o_ref):
    """params_ref: SMEM (2,) f32 = [alpha, beta]; x_ref/o_ref: VMEM (TM, D)."""
    x = x_ref[...].astype(jnp.float32)
    d = x.shape[-1]

    # Two-pass variance on the VMEM-resident tile (VPU/XLU only; free in an
    # HBM-bound kernel, numerically robust for |mean| >> std activations).
    mean = jnp.sum(x, axis=-1, keepdims=True) * jnp.float32(1.0 / d)
    centered = x - mean
    var = jnp.sum(centered * centered, axis=-1, keepdims=True) * jnp.float32(
        1.0 / (d - 1))
    std = jnp.sqrt(var)

    # Per-row reciprocal on the EUP; alpha folded in so the per-element work is
    # one multiply + one add on the VPU.
    inv = pl.reciprocal(std + jnp.float32(EPSILON), approx=False)
    scale = params_ref[0] * inv                     # (TM, 1)
    beta = params_ref[1]

    o_ref[...] = (centered * scale + beta).astype(o_ref.dtype)


@functools.partial(jax.jit, static_argnames=("tile_rows",))
def decoder_layernorm(x, alpha, beta, *, tile_rows=None):
    """Apply the Decoder's final LayerNorm via a Pallas TPU kernel.

    x: [B, S, D].  alpha, beta: scalar parameters.
    Normalizes over the last (D) axis; D maps to TPU lanes.
    """
    B, S, D = x.shape
    if D < 2:
        raise ValueError("LayerNorm with unbiased std requires D >= 2 (ddof=1).")
    rows = B * S
    itemsize = jnp.dtype(x.dtype).itemsize

    buffer_budget, vmem_limit = _vmem_config()
    if tile_rows is None:
        tile_rows = _pick_tile_rows(rows, D, itemsize, buffer_budget)

    x2d = x.reshape(rows, D)
    params = jnp.stack([jnp.asarray(alpha, jnp.float32).reshape(()),
                        jnp.asarray(beta, jnp.float32).reshape(())])

    # Ragged last block is handled by Pallas: out-of-bounds writes of the final
    # tile are dropped, and rows are independent, so no host-side pad/slice
    # (and hence no extra HBM copies) is needed.
    grid = (pl.cdiv(rows, tile_rows),)
    cost = pl.CostEstimate(
        flops=6 * rows * D,
        transcendentals=2 * rows,                 # sqrt + reciprocal per row
        bytes_accessed=2 * rows * D * itemsize,   # read x, write out
    )

    out2d = pl.pallas_call(
        _layernorm_kernel,
        out_shape=jax.ShapeDtypeStruct((rows, D), x.dtype),
        grid=grid,
        in_specs=[
            pl.BlockSpec(memory_space=pltpu.SMEM),            # [alpha, beta]
            pl.BlockSpec((tile_rows, D), lambda i: (i, 0)),   # x tile
        ],
        out_specs=pl.BlockSpec((tile_rows, D), lambda i: (i, 0)),
        compiler_params=pltpu.CompilerParams(
            dimension_semantics=("parallel",),   # shards rows across TCs on v7x
            vmem_limit_bytes=vmem_limit,
        ),
        cost_estimate=cost,
    )(params, x2d)

    return out2d.reshape(B, S, D)


def decoder_forward(x, encoder_output, src_mask, target_mask, alpha, beta):
    """Mirrors Decoder.forward: run the (opaque -> identity) layers, then norm."""
    # TODO(synk): opaque decoder blocks treated as identity (no definition given).
    del encoder_output, src_mask, target_mask
    return decoder_layernorm(x, alpha, beta)


def _reference_layernorm(x, alpha, beta):
    x32 = x.astype(jnp.float32)
    mean = jnp.mean(x32, axis=-1, keepdims=True)
    std = jnp.std(x32, axis=-1, keepdims=True, ddof=1)
    return (alpha * ((x32 - mean) / (std + EPSILON)) + beta).astype(x.dtype)


if __name__ == "__main__":
    key = jax.random.PRNGKey(0)
    B, S, D = 2, 8, 32
    k1, k2 = jax.random.split(key)
    x = jax.random.normal(k1, (B, S, D), dtype=jnp.float32)
    encoder_output = jax.random.normal(k2, (B, S, D), dtype=jnp.float32)
    src_mask = jnp.ones((B, 1, 1, S), dtype=jnp.float32)
    target_mask = jnp.ones((B, 1, S, S), dtype=jnp.float32)

    # Deterministic parameter init matching the PyTorch module's __init__.
    alpha = jnp.float32(1.0)   # torch.ones(1)
    beta = jnp.float32(0.0)    # torch.zeros(1)

    out = decoder_forward(x, encoder_output, src_mask, target_mask, alpha, beta)
    out = jax.block_until_ready(out)

    ref = _reference_layernorm(x, alpha, beta)
    assert out.shape == (B, S, D)
    assert jnp.allclose(out, ref, atol=1e-5, rtol=1e-5), "mismatch vs reference"

    # Exercise the ragged-last-block path (rows % tile_rows != 0) as well.
    B2, S2, D2 = 3, 37, 128
    x_big = jax.random.normal(jax.random.PRNGKey(1), (B2, S2, D2), jnp.float32)
    out_big = jax.block_until_ready(decoder_layernorm(x_big, alpha, beta))
    ref_big = _reference_layernorm(x_big, alpha, beta)
    assert jnp.allclose(out_big, ref_big, atol=1e-5, rtol=1e-5), "mismatch (big)"

    print("KERNEL_OK")
</pallas_src>

<mosaic_0001>
module attributes {stable_mosaic.version = 11 : i64} {
  func.func @_layernorm_kernel(%arg0: i32, %arg1: memref<2xf32, #tpu.memory_space<smem>>, %arg2: memref<8x32xf32, #tpu.memory_space<vmem>>, %arg3: memref<8x32xf32, #tpu.memory_space<vmem>>) attributes {dimension_semantics = [#tpu.dimension_semantics<parallel>], iteration_bounds = array<i64: 2>, scalar_prefetch = 0 : i64, scratch_operands = 0 : i64, tpu.core_type = #tpu.core_type<tc>, window_params = [{transform_indices = @transform_0, window_bounds = array<i64: 2>}, {transform_indices = @transform_1, window_bounds = array<i64: 8, 32>}, {transform_indices = @transform_2, window_bounds = array<i64: 8, 32>}]} {
    %c0 = arith.constant 0 : index
    %c0_0 = arith.constant 0 : index
    %0 = vector.load %arg2[%c0, %c0_0] : memref<8x32xf32, #tpu.memory_space<vmem>>, vector<8x32xf32>
    %cst = arith.constant dense<0.000000e+00> : vector<8xf32>
    %1 = vector.multi_reduction <add>, %0, %cst [1] : vector<8x32xf32> to vector<8xf32>
    %2 = vector.shape_cast %1 : vector<8xf32> to vector<8x1xf32>
    %cst_1 = arith.constant 3.125000e-02 : f32
    %3 = vector.broadcast %cst_1 : f32 to vector<8x1xf32>
    %4 = arith.mulf %2, %3 : vector<8x1xf32>
    %5 = vector.broadcast %4 : vector<8x1xf32> to vector<8x32xf32>
    %6 = arith.subf %0, %5 : vector<8x32xf32>
    %7 = arith.mulf %6, %6 : vector<8x32xf32>
    %cst_2 = arith.constant dense<0.000000e+00> : vector<8xf32>
    %8 = vector.multi_reduction <add>, %7, %cst_2 [1] : vector<8x32xf32> to vector<8xf32>
    %9 = vector.shape_cast %8 : vector<8xf32> to vector<8x1xf32>
    %cst_3 = arith.constant 0.0322580636 : f32
    %10 = vector.broadcast %cst_3 : f32 to vector<8x1xf32>
    %11 = arith.mulf %9, %10 : vector<8x1xf32>
    %12 = math.sqrt %11 : vector<8x1xf32>
    %cst_4 = arith.constant 9.99999997E-7 : f32
    %13 = vector.broadcast %cst_4 : f32 to vector<8x1xf32>
    %14 = arith.addf %12, %13 : vector<8x1xf32>
    %15 = tpu.reciprocal %14 : vector<8x1xf32> -> vector<8x1xf32>
    %c0_5 = arith.constant 0 : index
    %16 = memref.load %arg1[%c0_5] : memref<2xf32, #tpu.memory_space<smem>>
    %17 = vector.broadcast %16 : f32 to vector<8x1xf32>
    %18 = arith.mulf %17, %15 : vector<8x1xf32>
    %c1 = arith.constant 1 : index
    %19 = memref.load %arg1[%c1] : memref<2xf32, #tpu.memory_space<smem>>
    %20 = vector.broadcast %18 : vector<8x1xf32> to vector<8x32xf32>
    %21 = arith.mulf %6, %20 : vector<8x32xf32>
    %22 = vector.broadcast %19 : f32 to vector<8x32xf32>
    %23 = arith.addf %21, %22 : vector<8x32xf32>
    %c0_6 = arith.constant 0 : index
    %c0_7 = arith.constant 0 : index
    %24 = vector.load %arg3[%c0_6, %c0_7] : memref<8x32xf32, #tpu.memory_space<vmem>>, vector<8x32xf32>
    tpu.vector_store %arg3[%c0_6, %c0_7], %23 {strides = array<i32>} : memref<8x32xf32, #tpu.memory_space<vmem>>, vector<8x32xf32>,
    return
  }
  func.func @transform_0(%arg0: i32) -> i32 {
    %c0_i32 = arith.constant 0 : i32
    %c0_i32_0 = arith.constant 0 : i32
    return %c0_i32 : i32
  }
  func.func @transform_1(%arg0: i32) -> (i32, i32) {
    %c0_i32 = arith.constant 0 : i32
    %c0_i32_0 = arith.constant 0 : i32
    return %arg0, %c0_i32 : i32, i32
  }
  func.func @transform_2(%arg0: i32) -> (i32, i32) {
    %c0_i32 = arith.constant 0 : i32
    %c0_i32_0 = arith.constant 0 : i32
    return %arg0, %c0_i32 : i32, i32
  }
}

</mosaic_0001>

<bundles_post_ra>
// kernel: decoder_layernorm.1
= control target key start
LH: loop header
LB: loop body
LE: loop exit
PB: predicated region body
PF: predicated region fallthrough
CT: control target
= control target key end

     0   :  { %7 = vsyncpa [#allocation5], 0  ;;  %s674_s0 = inlined_call_operand.vmem [shape: f32[2], index: 0, kind: input, shape index: {}]   ;;  %s675_s1 = inlined_call_operand.hbm [shape: f32[16,32], index: 1, kind: input, shape index: {}]   ;;  %s676_s2 = inlined_call_operand.hbm [shape: f32[16,32], index: 2, kind: output, shape index: {}]  }
   0x1   :  { %8 = vsyncpa [#allocation3], 0 }
   0x2   :  { %10 = vsyncpa [#allocation3 + $0x1], 0 }
   0x3   :  { %11 = vsyncpa [#allocation4], 0 }
   0x4   :  { %13 = vsyncpa [#allocation4 + $0x1], 0  ;;  %s529_s9 = smov 0   ;;  %s531_s10 = smov 0  }
   0x5   :  { %s533_s11 = smov 0   ;;  %s535_s12 = smov 0  }
   0x6 LB: > { %s550_s13 = sadd.s32 4294967295, %s511_s12   ;;  %s320_s14 = sadd.s32 4294967294, %s511_s12   ;;  %s511_s12 = sphi %s535_s12, %s686_s12   ;;  %s507_s11 = sphi %s533_s11, %s685_s11   ;;  %s503_s10 = sphi %s531_s10, %s684_s10   ;;  %s499_s9 = sphi %s529_s9, %s683_s9  }
   0x7   : > { %p60_p0 = scmp.ne.s32.totalorder %s503_s10, %s499_s9  ;;  %p61_p1 = scmp.eq.s32.totalorder %s550_s13, 0 }
   0x8   : > { %p84_p2 = scmp.eq.s32.totalorder %s550_s13, 1  ;;  %p90_p3 = scmp.eq.s32.totalorder %s320_s14, 1 }
   0x9   : > { %p559_p4 = por %p61_p1, %p60_p0  ;;  %p321_p5 = scmp.ge.s32.totalorder %s511_s12, 1 }
   0xa   : > { %p564_p6 = por %p90_p3, %p60_p0  ;;  %p97_p7 = scmp.lt.s32.totalorder %s511_s12, 3 }
   0xb   : > { %s109_s19 = sshll.u32 %s674_s0, 4  ;;  %s580_s21 = sadd.s32 1, %s511_s12   ;;  %s110_s19 = int_to_ptr.vmem [resolvable:$true] %s109_s19 }
   0xc   : > { %p572_p8 = pnand %p321_p5, %p97_p7  ;;  %s44_s22 = ssub.s32 %s511_s12, %s580_s21 }
   0xd   : > { %p45_p12 = scmp.eq.s32.totalorder %s44_s22, 0  ;;  %s47_s23 = sadd.s32 1, %s507_s11 }
   0xe   : > { %p343_p10 = pneg %p572_p8  ;;  %p54_p13 = scmp.ne.s32.totalorder %s507_s11, %s503_s10 }
   0xf   : > { %s513_s24 = smov [#allocation2]   ;;  %p55_p0 = scmp.eq.s32.totalorder %s511_s12, 0 }
  0x10   : > { %p344_p11 = pnand %p343_p10, %p61_p1  ;;  %p595_p3 = por %p84_p2, %p54_p13 }
  0x11   : > { %s590_s25 = scalar_select %p45_p12, %s507_s11, %s47_s23  }
  0x12   : > { %346 = dma.vmem_to_smem (!%p344_p11), %s110_s19, 16, %s513_s24, [#allocation5]  }
  0x13   : > { %s120_s27 = sand.u32 1, %s507_s11   ;;  %p56_p5 = por %p55_p0, %p54_p13 }
  0x14   : > { %p356_p7 = scmp.lt.s32.totalorder %s511_s12, 2  ;;  %s324_s28 = sshll.u32 %s120_s27, 3 }
  0x15   : > { %s325_s29 = sshll.u32 %s511_s12, 3  ;;  %s124_s6 = scalar_lea.vmem [#allocation6], %s324_s28 }
  0x16   : > { %s128_s4 = scalar_lea.hbm %s675_s1, %s325_s29  ;;  %s132_s7 = sshll.u32 %s124_s6, 4  ;;  %s133_s7 = int_to_ptr.vmem [resolvable:$true] %s132_s7 }
  0x17   : > { %s130_s5 = sshll.u32 %s128_s4, 4  ;;  %p605_p10 = pnand %p356_p7, %p56_p5  ;;  %s131_s5 = int_to_ptr.hbm [resolvable:$true] %s130_s5 }
  0x18   : > { %s121_s14 = scalar_lea.sflag [#allocation3], %s120_s27  ;;  %s411_s17 = sshra.s32 %s131_s5, 4  ;;  %s412_s17 = int_to_ptr.hbm [resolvable:$true] %s411_s17 }
  0x19   : > { %s413_s18 = scalar_lea.hbm %s412_s17, 8  ;;  %p415_p11 = pneg %p605_p10 }
  0x1a   : > { %p414_p2 = scmp.ne.s32.totalorder %s412_s17, %s413_s18  ;;  %s418_s23 = scalar_lea.hbm %s675_s1, 16 }
  0x1b   : > { %p419_p0 = scmp.lt.s32.totalorder %s412_s17, %s675_s1  ;;  %p420_p5 = scmp.lt.s32.totalorder %s418_s23, %s413_s18 }
  0x1c   : > { %p416_p12 = pnand %p415_p11, %p414_p2 }
  0x1d   : > { %p421_p7 = por %p420_p5, %p419_p0 }
  0x1e   : > { %p417_p13 = pneg %p416_p12 }
  0x20   : > { %p422_p9 = pnand %p421_p7, %p417_p13 }
  0x22   : > { %425 = shalt.err (!%p422_p9)
}
  0x23   : > { %350 = dma.hbm_to_vmem [thread:$0]  (!%p605_p10), %s131_s5, 128, %s133_s7, %s121_s14  }
  0x24   : > { %141 = sbr.rel (%p572_p8) target bundleno = 340 (0x154), region = 28 }
  0x29   : > { %486 = dma.done.wait (%p61_p1), [#allocation5], 16  }
  0x2a   : > { %488 = vsyncadd (%p61_p1), [#allocation5], 4294967280  ;;  %s626_s27 = sand.u32 1, %s503_s10  }
  0x2b   : > { %s328_s29 = sshll.u32 %s626_s27, 3  ;;  %s149_s30 = scalar_lea.sflag [#allocation3], %s626_s27 }
  0x2c   : > { %s152_s3 = scalar_lea.vmem [#allocation6], %s328_s29 }
  0x2d   : > { %490 = dma.done.wait (%p559_p4), %s149_s30, 128  }
  0x2e   : > { %492 = vsyncadd (%p559_p4), %s149_s30, 4294967168 }
  0x2f   : > { %158 = sfence }
  0x30   : > { %v175_v0 = vld [vmem:[%s152_s3] sm:$0xff]  ;;  %vm176_vm0 = vcmask 261120   ;;  %s214_s15 = sld [smem:[#allocation2]]  ;;  %s332_s4 = sshll.u32 %s550_s13, 3 }
  0x31   : > { %v177_v1 = vsel %vm176_vm0, %v175_v0, 0.0  ;;  %s330_s20 = sld [smem:[#allocation2 + $0x1]]  ;;  %s233_s7 = scalar_lea.hbm %s676_s2, %s332_s4 }
  0x32   : > { %178 = vadd.xlane.f32.xlu0 %v177_v1  ;;  %s174_s8 = scalar_lea.vmem [#allocation7], %s328_s29  ;;  %s237_s13 = sshll.u32 %s233_s7, 4  ;;  %s238_s13 = int_to_ptr.hbm [resolvable:$true] %s237_s13 }
  0x33   : > { %s235_s14 = sshll.u32 %s174_s8, 4  ;;  %s223_s17 = scalar_lea.sflag [#allocation4], %s626_s27  ;;  %s236_s14 = int_to_ptr.vmem [resolvable:$true] %s235_s14 }
  0x34   : > { %s455_s18 = sshra.s32 %s238_s13, 4  ;;  %s461_s24 = scalar_lea.hbm %s676_s2, 16  ;;  %s456_s18 = int_to_ptr.hbm [resolvable:$true] %s455_s18 }
  0x35   : > { %s457_s19 = scalar_lea.hbm %s456_s18, 8  ;;  %p462_p9 = scmp.lt.s32.totalorder %s456_s18, %s676_s2 }
  0x36   : > { %v215_v28 = vstv %s214_s15  ;;  %p458_p1 = scmp.ne.s32.totalorder %s456_s18, %s457_s19  ;;  %p463_p10 = scmp.lt.s32.totalorder %s461_s24, %s457_s19 }
  0x37   : > { %v219_v32 = vstv %s330_s20 }
  0x38   : > { %p459_p4 = pnand %p458_p1, %p595_p3  ;;  %p464_p2 = por %p463_p10, %p462_p9 }
  0x3a   : > { %p460_p8 = pneg %p459_p4 }
  0x3c   : > { %p465_p11 = pnand %p464_p2, %p460_p8 }
  0xa5   : > { %v179_v2 = vpop.xlane.xlu0 %178 }
  0xa6   : > { %v180_v3 = vmul.f32 0.03125, %v179_v2 }
  0xa8   : > { %v181_v4 = vsub.f32 %v175_v0, %v180_v3 }
  0xaa   : > { %v182_v5 = vmul.f32 %v181_v4, %v181_v4 }
  0xac   : > { %v183_v6 = vsel %vm176_vm0, %v182_v5, 0.0 }
  0xad   : > { %184 = vadd.xlane.f32.xlu0 %v183_v6 }
 0x120   : > { %v185_v7 = vpop.xlane.xlu0 %184 }
 0x121   : > { %v186_v8 = vmul.f32 0.032258064, %v185_v7 }
 0x123   : > { %392 = vrsqrt.f32 %v186_v8  ;;  %vm194_vm1 = vcmp.eq.f32.partialorder %v186_v8, inf  ;;  %v197_v16 = vand.u32 2147483648, %v186_v8  ;;  %vm196_vm2 = vcmp.eq.f32.partialorder %v186_v8, 0.0 }
 0x129   : > { %v393_v9 = vpop.eup %392 }
 0x12a   : > { %v188_v10 = vmul.f32 %v393_v9, %v186_v8 }
 0x12c   : > { %v189_v11 = vmul.f32 %v393_v9, %v188_v10 }
 0x12e   : > { %v190_v12 = vmul.f32 0.5, %v189_v11 }
 0x130   : > { %v191_v13 = vsub.f32 1.5, %v190_v12 }
 0x132   : > { %v192_v14 = vmul.f32 %v393_v9, %v191_v13 }
 0x134   : > { %v193_v15 = vmul.f32 %v192_v14, %v186_v8 }
 0x136   : > { %v195_v17 = vsel %vm194_vm1, %v186_v8, %v193_v15 }
 0x137   : > { %v198_v18 = vsel %vm196_vm2, %v197_v16, %v195_v17 }
 0x138   : > { %v199_v19 = vadd.f32 1e-06, %v198_v18 }
 0x13a   : > { %394 = vrcp.f32 %v199_v19  ;;  %v211_v23 = vand.u32 2147483648, %v199_v19  ;;  %v209_v25 = vand.u32 2147483647, %v199_v19  ;;  %vm205_vm4 = vweird.f32 %v199_v19 }
 0x13c   : > { %v212_v27 = vor.u32 1.1754944e-38, %v211_v23  ;;  %vm210_vm6 = vcmp.eq.f32.partialorder %v209_v25, 8.507059e+37 }
 0x140   : > { %v395_v20 = vpop.eup %394 }
 0x141   : > { %v201_v21 = vmul.f32 %v395_v20, %v199_v19  ;;  %vm206_vm3 = vweird.f32 %v395_v20 }
 0x142   : > { %vm207_vm5 = vmor %vm205_vm4, %vm206_vm3 }
 0x143   : > { %v202_v22 = vsub.f32 1.0, %v201_v21 }
 0x145   : > { %v203_v24 = vmul.f32 %v395_v20, %v202_v22 }
 0x147   : > { %v204_v26 = vadd.f32 %v395_v20, %v203_v24 }
 0x149   : > { %v208_v29 = vsel %vm207_vm5, %v395_v20, %v204_v26 }
 0x14a   : > { %v213_v30 = vsel %vm210_vm6, %v212_v27, %v208_v29 }
 0x14b   : > { %v216_v31 = vmul.f32 %v215_v28, %v213_v30 }
 0x14d   : > { %v218_v33 = vmul.f32 %v216_v31, %v181_v4 }
 0x14f   : > { %v220_v34 = vadd.f32 %v219_v32, %v218_v33 }
 0x151   : > { %221 = vst.msk [vmem:[%s174_s8] sm:$0xff] %vm176_vm0, %v220_v34 }
 0x152   : > { %468 = shalt.err (!%p465_p11)
}
 0x153   : > { %341 = dma.vmem_to_hbm [thread:$0]  (%p595_p3), %s236_s14, 128, %s238_s13, %s223_s17  }
 0x154 PF: > { %s249_s27 = sand.u32 1, %s499_s9   ;;  %p682_p12 = scmp.ge.s32.totalorder %s511_s12, 2 }
 0x155   : > { %s250_s30 = scalar_lea.sflag [#allocation4], %s249_s27 }
 0x156   : > { %p352_p13 = pnand %p682_p12, %p564_p6 }
 0x158   : > { %p353_p0 = pneg %p352_p13 }
 0x15a   : > { %494 = dma.done.wait (%p353_p0), %s250_s30, 128  }
 0x15b   : > { %496 = vsyncadd (%p353_p0), %s250_s30, 4294967168  ;;  %p16_p5 = scmp.ge.s32.totalorder %s580_s21, 4   ;;  %s683_s9 = smov %s503_s10 }
 0x15c   : > { %s684_s10 = smov %s507_s11  ;;  %s685_s11 = smov %s590_s25 }
 0x15d   : > { %s686_s12 = smov %s580_s21  ;;  %18 = sbr.rel (!%p16_p5) target bundleno = 6 (0x6), region = 78 }
 0x162   :  { %256 = vsyncpa [#allocation3], 1 }
 0x163   :  { %258 = vsyncpa [#allocation3 + $0x1], 1 }
 0x164   :  { %259 = vsyncpa [#allocation4], 1 }
 0x165   :  { %261 = vsyncpa [#allocation4 + $0x1], 1 }
 0x166   :  { %262 = vsyncpa [#allocation5], 1 }
 0x167   :  { %264 = vsyncpa [#allocation5 + $0x1], 1 }

</bundles_post_ra>
